<compile_context>
chip_gen: v6e
topology: v6e:2x2x1
jax: 0.10.0
libtpu: 0.0.40
codegen_flags: <defaults>
</compile_context>

<pallas_src>
import math

import numpy as np
import jax
import jax.numpy as jnp
from jax import lax
from jax.experimental import pallas as pl
from jax.experimental.pallas import tpu as pltpu


# ----------------------------------------------------------------------------
# Pallas kernel: one grid step = Nb images, lane-dense (H, W*C) activations
# ----------------------------------------------------------------------------
def _make_block_kernel(Nb, H, WC):
    M = Nb * H
    K = 3 * WC

    def kernel(x_ref, w1_ref, b1_ref, w2_ref, b2_ref, eca_ref, out_ref,
               cat1_ref, cat2_ref):
        x = x_ref[...]                                      # (Nb, H, WC) f32
        zrow = jnp.zeros((Nb, 1, WC), jnp.float32)

        def fill_cat(cat_ref, a):
            # K-fused conv operand (fully rewritten each step -> megacore
            # safe, no halo leakage across images):
            #   cat[:, h,    0:WC ] = a[:, h-1]   (zero at h = 0)
            #   cat[:, h,  WC:2WC ] = a[:, h]
            #   cat[:, h, 2WC:3WC ] = a[:, h+1]   (zero at h = H-1)
            cat_ref[:, 0:1, 0:WC] = zrow
            cat_ref[:, 1:H, 0:WC] = a[:, 0:H - 1, :]
            cat_ref[:, :, WC:2 * WC] = a
            cat_ref[:, 0:H - 1, 2 * WC:3 * WC] = a[:, 1:H, :]
            cat_ref[:, H - 1:H, 2 * WC:3 * WC] = zrow

        # ---- conv1 (BN1 scale folded into weights) + bias + ReLU ------------
        fill_cat(cat1_ref, x)
        m1 = cat1_ref[...].reshape(M, K).astype(jnp.bfloat16)
        acc1 = jnp.dot(m1, w1_ref[...], preferred_element_type=jnp.float32)
        h1 = jnp.maximum(acc1 + b1_ref[...], 0.0).reshape(Nb, H, WC)

        # ---- conv2 (BN2 scale folded into weights) + bias -------------------
        fill_cat(cat2_ref, h1)
        m2 = cat2_ref[...].reshape(M, K).astype(jnp.bfloat16)
        acc2 = jnp.dot(m2, w2_ref[...], preferred_element_type=jnp.float32)
        o2 = (acc2 + b2_ref[...]).reshape(Nb, H, WC)

        # ---- ECA gate: per-image H-mean, then ONE batched (Nb, WC) matmul
        #      whose matrix fuses W-mean + banded channel conv + lane tiling.
        rowmean = jnp.mean(o2, axis=1)                      # (Nb, WC)
        gate = jax.nn.sigmoid(
            jnp.dot(rowmean.astype(jnp.bfloat16), eca_ref[...],
                    preferred_element_type=jnp.float32))    # (Nb, WC)

        # ---- gate * o2 + residual, final ReLU --------------------------------
        out_ref[...] = jnp.maximum(o2 * gate[:, None, :] + x, 0.0)

    return kernel


# ----------------------------------------------------------------------------
# One-time weight preparation (hoisted out of the forward path)
# ----------------------------------------------------------------------------
def prepare_block_params(params, W):
    """Builds the fused, BN-folded, K-concatenated bf16 kernel weights ONCE."""
    w1, s1, b1, w2, s2, b2, eca_mat = params
    C = w1.shape[-1]
    WC = W * C

    # Horizontal-tap placement matrix; band truncation at the matrix edge
    # implements SAME zero padding along W.
    P = np.zeros((3, W, W), np.float32)
    for dx in range(3):
        for wo in range(W):
            wi = wo + dx - 1
            if 0 <= wi < W:
                P[dx, wi, wo] = 1.0
    P = jnp.asarray(P)

    def fused(w_hwio, scale):
        # R[dy, wi, ci, wo, co] = sum_dx P[dx, wi, wo] * w[dy, dx, ci, co]
        R = jnp.einsum('xab,yxio->yaibo', P, w_hwio).reshape(3, WC, WC)
        R = R * jnp.tile(scale, (1, W))[None, :, :]          # fold BN scale
        return R.reshape(3 * WC, WC).astype(jnp.bfloat16)    # K-fused taps

    w1cat = fused(w1, s1)
    w2cat = fused(w2, s2)
    b1f = jnp.tile(b1, (1, W)).astype(jnp.float32)
    b2f = jnp.tile(b2, (1, W)).astype(jnp.float32)
    # Fuses the W-average (1/W), the banded channel conv and the lane tiling
    # of the resulting gate into one (W*C, W*C) matrix.
    eca_full = (jnp.tile(eca_mat, (W, W)) / W).astype(jnp.bfloat16)
    return (w1cat, b1f, w2cat, b2f, eca_full)


def _choose_nb(N, H, target_rows=128):
    """Largest per-step image batch Nb with Nb | N, Nb*H <= target_rows and
    (when N >= 2) a grid of >= 2 steps so v7x keeps both TensorCores busy."""
    best = 1
    for nb in range(1, N + 1):
        if N % nb != 0:
            continue
        if nb > 1 and nb * H > target_rows:
            continue
        if N >= 2 and N // nb < 2:
            continue
        best = nb
    return best


# ----------------------------------------------------------------------------
# Forward wrappers
# ----------------------------------------------------------------------------
def eca_basic_block_lane_dense(x_ld, prep):
    """Hot path: activations stay lane-dense (N, H, W*C) end-to-end."""
    N, H, WC = x_ld.shape
    w1cat, b1f, w2cat, b2f, eca_full = prep
    nb = _choose_nb(N, H)
    steps = N // nb

    kernel = _make_block_kernel(nb, H, WC)
    flops = int(2 * 2 * N * H * WC * 3 * WC + 2 * N * WC * WC)
    bytes_acc = int(2 * N * H * WC * 4
                    + steps * ((2 * 3 * WC * WC + WC * WC) * 2 + 2 * WC * 4))
    cost = pl.CostEstimate(flops=flops, transcendentals=int(N * WC),
                           bytes_accessed=bytes_acc)

    return pl.pallas_call(
        kernel,
        out_shape=jax.ShapeDtypeStruct((N, H, WC), jnp.float32),
        grid_spec=pltpu.PrefetchScalarGridSpec(
            num_scalar_prefetch=0,
            grid=(steps,),
            in_specs=[
                pl.BlockSpec((nb, H, WC), lambda n: (n, 0, 0)),   # x (lane-dense)
                pl.BlockSpec((3 * WC, WC), lambda n: (0, 0)),     # conv1 fused W
                pl.BlockSpec((1, WC), lambda n: (0, 0)),          # bn1 bias
                pl.BlockSpec((3 * WC, WC), lambda n: (0, 0)),     # conv2 fused W
                pl.BlockSpec((1, WC), lambda n: (0, 0)),          # bn2 bias
                pl.BlockSpec((WC, WC), lambda n: (0, 0)),         # ECA fused mat
            ],
            out_specs=pl.BlockSpec((nb, H, WC), lambda n: (n, 0, 0)),
            scratch_shapes=[pltpu.VMEM((nb, H, 3 * WC), jnp.float32),
                            pltpu.VMEM((nb, H, 3 * WC), jnp.float32)],
        ),
        compiler_params=pltpu.CompilerParams(
            dimension_semantics=("parallel",)),
        cost_estimate=cost,
    )(x_ld, w1cat, b1f, w2cat, b2f, eca_full)


def eca_basic_block(x_nchw, prep):
    """NCHW interface matching the PyTorch module (stride=1, no downsample)."""
    # TODO(synk): in a full network keep activations lane-dense (N, H, W*C)
    # end-to-end; these NCHW<->lane-dense transposes exist only to match the
    # PyTorch interface for this standalone test.
    N, C, H, W = x_nchw.shape
    x_ld = jnp.transpose(x_nchw, (0, 2, 3, 1)).reshape(N, H, W * C)
    out_ld = eca_basic_block_lane_dense(x_ld.astype(jnp.float32), prep)
    return jnp.transpose(out_ld.reshape(N, H, W, C), (0, 3, 1, 2))


# ----------------------------------------------------------------------------
# Parameter construction (deterministic, synthetic) + pure-JAX f32 reference
# ----------------------------------------------------------------------------
def make_params(key, channels, gamma=2, b=1, eps=1e-5):
    ks = jax.random.split(key, 10)
    C = channels

    # conv weights (PyTorch OIHW) -> HWIO for NHWC convolution
    w1_oihw = jax.random.normal(ks[0], (C, C, 3, 3), jnp.float32) * 0.1
    w2_oihw = jax.random.normal(ks[1], (C, C, 3, 3), jnp.float32) * 0.1
    w1 = jnp.transpose(w1_oihw, (2, 3, 1, 0))
    w2 = jnp.transpose(w2_oihw, (2, 3, 1, 0))

    # BatchNorm params (inference mode: fold running stats into scale/bias).
    # TODO(synk): PyTorch .train() mode would use batch statistics; eval-mode
    # BN with deterministic running stats is reproduced here.
    def bn(kg, kb, km, kv):
        g = 1.0 + 0.1 * jax.random.normal(kg, (C,), jnp.float32)
        be = 0.1 * jax.random.normal(kb, (C,), jnp.float32)
        rm = 0.1 * jax.random.normal(km, (C,), jnp.float32)
        rv = 1.0 + 0.1 * jnp.abs(jax.random.normal(kv, (C,), jnp.float32))
        scale = g / jnp.sqrt(rv + eps)
        bias = be - rm * scale
        return scale.reshape(1, C), bias.reshape(1, C)

    s1, b1 = bn(ks[2], ks[3], ks[4], ks[5])
    s2, b2 = bn(ks[6], ks[7], ks[8], ks[9])

    # ECA 1-D conv over channels, expressed as a banded (C, C) matrix.
    t = int(abs((math.log(C, 2) + b) / gamma))
    k = t if t % 2 else t + 1
    pad = (k - 1) // 2
    eca_w = jax.random.normal(jax.random.fold_in(key, 123), (k,),
                              jnp.float32) * 0.5
    M = np.zeros((C, C), np.float32)
    eca_w_np = np.asarray(eca_w)
    for c_out in range(C):
        for j in range(k):
            c_in = c_out + j - pad
            if 0 <= c_in < C:
                M[c_in, c_out] = eca_w_np[j]
    eca_mat = jnp.asarray(M)

    return (w1, s1, b1, w2, s2, b2, eca_mat)


def reference_forward(x_nchw, params):
    """Pure-JAX f32 reference of ECABasicBlock forward (same semantics)."""
    w1, s1, b1, w2, s2, b2, eca_mat = params
    x = jnp.transpose(x_nchw, (0, 2, 3, 1))
    dn = ("NHWC", "HWIO", "NHWC")
    o = lax.conv_general_dilated(x, w1, (1, 1), "SAME", dimension_numbers=dn)
    o = jnp.maximum(o * s1.reshape(1, 1, 1, -1) + b1.reshape(1, 1, 1, -1), 0.0)
    o = lax.conv_general_dilated(o, w2, (1, 1), "SAME", dimension_numbers=dn)
    o = o * s2.reshape(1, 1, 1, -1) + b2.reshape(1, 1, 1, -1)
    y = jnp.mean(o, axis=(1, 2))                       # (N, C) global avg pool
    z = jax.nn.sigmoid(y @ eca_mat)                    # 1-D channel conv
    o = o * z[:, None, None, :]
    o = jnp.maximum(o + x, 0.0)
    return jnp.transpose(o, (0, 3, 1, 2))


# ----------------------------------------------------------------------------
if __name__ == "__main__":
    key = jax.random.PRNGKey(0)
    N, C, H, W = 8, 8, 16, 16            # inplanes = planes = 8, stride = 1
    kx, kp = jax.random.split(key)
    x = jax.random.normal(kx, (N, C, H, W), jnp.float32)

    params = make_params(kp, channels=C)
    prep = prepare_block_params(params, W=W)   # built ONCE, outside hot path

    fwd = jax.jit(eca_basic_block)
    out = jax.block_until_ready(fwd(x, prep))

    ref = jax.block_until_ready(reference_forward(x, params))
    # Tolerance loosened vs. the f32 reference because the MXU operands /
    # weights are bf16 (f32 accumulation).
    np.testing.assert_allclose(np.asarray(out), np.asarray(ref),
                               rtol=3e-2, atol=3e-2)

    print("KERNEL_OK")
</pallas_src>

<mosaic_0001>
module attributes {stable_mosaic.version = 11 : i64} {
  func.func @kernel(%arg0: i32, %arg1: memref<4x16x128xf32, #tpu.memory_space<vmem>>, %arg2: memref<384x128xbf16, #tpu.memory_space<vmem>>, %arg3: memref<1x128xf32, #tpu.memory_space<vmem>>, %arg4: memref<384x128xbf16, #tpu.memory_space<vmem>>, %arg5: memref<1x128xf32, #tpu.memory_space<vmem>>, %arg6: memref<128x128xbf16, #tpu.memory_space<vmem>>, %arg7: memref<4x16x128xf32, #tpu.memory_space<vmem>>, %arg8: memref<4x16x384xf32, #tpu.memory_space<vmem>>, %arg9: memref<4x16x384xf32, #tpu.memory_space<vmem>>) attributes {dimension_semantics = [#tpu.dimension_semantics<parallel>], iteration_bounds = array<i64: 2>, scalar_prefetch = 0 : i64, scratch_operands = 2 : i64, tpu.core_type = #tpu.core_type<tc>, window_params = [{transform_indices = @transform_0, window_bounds = array<i64: 4, 16, 128>}, {pipeline_mode = #tpu.pipeline_mode<synchronous>, transform_indices = @transform_1, window_bounds = array<i64: 384, 128>}, {pipeline_mode = #tpu.pipeline_mode<synchronous>, transform_indices = @transform_2, window_bounds = array<i64: 1, 128>}, {pipeline_mode = #tpu.pipeline_mode<synchronous>, transform_indices = @transform_3, window_bounds = array<i64: 384, 128>}, {pipeline_mode = #tpu.pipeline_mode<synchronous>, transform_indices = @transform_4, window_bounds = array<i64: 1, 128>}, {pipeline_mode = #tpu.pipeline_mode<synchronous>, transform_indices = @transform_5, window_bounds = array<i64: 128, 128>}, {transform_indices = @transform_6, window_bounds = array<i64: 4, 16, 128>}]} {
    %c0 = arith.constant 0 : index
    %c0_0 = arith.constant 0 : index
    %c0_1 = arith.constant 0 : index
    %0 = vector.load %arg1[%c0, %c0_0, %c0_1] : memref<4x16x128xf32, #tpu.memory_space<vmem>>, vector<4x16x128xf32>
    %cst = arith.constant 0.000000e+00 : f32
    %1 = vector.broadcast %cst : f32 to vector<4x1x128xf32>
    %c0_2 = arith.constant 0 : index
    %c0_3 = arith.constant 0 : index
    %c0_4 = arith.constant 0 : index
    %2 = vector.load %arg8[%c0_2, %c0_3, %c0_4] : memref<4x16x384xf32, #tpu.memory_space<vmem>>, vector<4x1x128xf32>
    tpu.vector_store %arg8[%c0_2, %c0_3, %c0_4], %1 {strides = array<i32>} : memref<4x16x384xf32, #tpu.memory_space<vmem>>, vector<4x1x128xf32>,
    %3 = vector.extract_strided_slice %0 {offsets = [0, 0, 0], sizes = [4, 15, 128], strides = [1, 1, 1]} : vector<4x16x128xf32> to vector<4x15x128xf32>
    %c0_5 = arith.constant 0 : index
    %c1 = arith.constant 1 : index
    %c0_6 = arith.constant 0 : index
    %4 = vector.load %arg8[%c0_5, %c1, %c0_6] : memref<4x16x384xf32, #tpu.memory_space<vmem>>, vector<4x15x128xf32>
    tpu.vector_store %arg8[%c0_5, %c1, %c0_6], %3 {strides = array<i32>} : memref<4x16x384xf32, #tpu.memory_space<vmem>>, vector<4x15x128xf32>,
    %c0_7 = arith.constant 0 : index
    %c0_8 = arith.constant 0 : index
    %c128 = arith.constant 128 : index
    %5 = vector.load %arg8[%c0_7, %c0_8, %c128] : memref<4x16x384xf32, #tpu.memory_space<vmem>>, vector<4x16x128xf32>
    tpu.vector_store %arg8[%c0_7, %c0_8, %c128], %0 {strides = array<i32>} : memref<4x16x384xf32, #tpu.memory_space<vmem>>, vector<4x16x128xf32>,
    %6 = vector.extract_strided_slice %0 {offsets = [0, 1, 0], sizes = [4, 15, 128], strides = [1, 1, 1]} : vector<4x16x128xf32> to vector<4x15x128xf32>
    %c0_9 = arith.constant 0 : index
    %c0_10 = arith.constant 0 : index
    %c256 = arith.constant 256 : index
    %7 = vector.load %arg8[%c0_9, %c0_10, %c256] : memref<4x16x384xf32, #tpu.memory_space<vmem>>, vector<4x15x128xf32>
    tpu.vector_store %arg8[%c0_9, %c0_10, %c256], %6 {strides = array<i32>} : memref<4x16x384xf32, #tpu.memory_space<vmem>>, vector<4x15x128xf32>,
    %c0_11 = arith.constant 0 : index
    %c15 = arith.constant 15 : index
    %c256_12 = arith.constant 256 : index
    %8 = vector.load %arg8[%c0_11, %c15, %c256_12] : memref<4x16x384xf32, #tpu.memory_space<vmem>>, vector<4x1x128xf32>
    tpu.vector_store %arg8[%c0_11, %c15, %c256_12], %1 {strides = array<i32>} : memref<4x16x384xf32, #tpu.memory_space<vmem>>, vector<4x1x128xf32>,
    %c0_13 = arith.constant 0 : index
    %c0_14 = arith.constant 0 : index
    %c0_15 = arith.constant 0 : index
    %9 = vector.load %arg8[%c0_13, %c0_14, %c0_15] : memref<4x16x384xf32, #tpu.memory_space<vmem>>, vector<4x16x384xf32>
    %10 = vector.shape_cast %9 : vector<4x16x384xf32> to vector<64x384xf32>
    %11 = arith.truncf %10 : vector<64x384xf32> to vector<64x384xbf16>
    %c0_16 = arith.constant 0 : index
    %c0_17 = arith.constant 0 : index
    %12 = vector.load %arg2[%c0_16, %c0_17] : memref<384x128xbf16, #tpu.memory_space<vmem>>, vector<384x128xbf16>
    %cst_18 = arith.constant dense<0.000000e+00> : vector<64x128xf32>
    %13 = tpu.matmul %11, %12, %cst_18 {dimension_numbers = #tpu.dot_dimension_numbers<[1], [0], [0], [1], [0, 0, 1, 1], [], []>} : vector<64x384xbf16>, vector<384x128xbf16>, vector<64x128xf32> -> vector<64x128xf32>
    %c0_19 = arith.constant 0 : index
    %c0_20 = arith.constant 0 : index
    %14 = vector.load %arg3[%c0_19, %c0_20] : memref<1x128xf32, #tpu.memory_space<vmem>>, vector<1x128xf32>
    %15 = vector.broadcast %14 : vector<1x128xf32> to vector<64x128xf32>
    %16 = arith.addf %13, %15 : vector<64x128xf32>
    %cst_21 = arith.constant 0.000000e+00 : f32
    %17 = vector.broadcast %cst_21 : f32 to vector<64x128xf32>
    %18 = arith.maximumf %16, %17 : vector<64x128xf32>
    %19 = vector.shape_cast %18 : vector<64x128xf32> to vector<4x16x128xf32>
    %c0_22 = arith.constant 0 : index
    %c0_23 = arith.constant 0 : index
    %c0_24 = arith.constant 0 : index
    %20 = vector.load %arg9[%c0_22, %c0_23, %c0_24] : memref<4x16x384xf32, #tpu.memory_space<vmem>>, vector<4x1x128xf32>
    tpu.vector_store %arg9[%c0_22, %c0_23, %c0_24], %1 {strides = array<i32>} : memref<4x16x384xf32, #tpu.memory_space<vmem>>, vector<4x1x128xf32>,
    %21 = vector.extract_strided_slice %19 {offsets = [0, 0, 0], sizes = [4, 15, 128], strides = [1, 1, 1]} : vector<4x16x128xf32> to vector<4x15x128xf32>
    %c0_25 = arith.constant 0 : index
    %c1_26 = arith.constant 1 : index
    %c0_27 = arith.constant 0 : index
    %22 = vector.load %arg9[%c0_25, %c1_26, %c0_27] : memref<4x16x384xf32, #tpu.memory_space<vmem>>, vector<4x15x128xf32>
    tpu.vector_store %arg9[%c0_25, %c1_26, %c0_27], %21 {strides = array<i32>} : memref<4x16x384xf32, #tpu.memory_space<vmem>>, vector<4x15x128xf32>,
    %c0_28 = arith.constant 0 : index
    %c0_29 = arith.constant 0 : index
    %c128_30 = arith.constant 128 : index
    %23 = vector.load %arg9[%c0_28, %c0_29, %c128_30] : memref<4x16x384xf32, #tpu.memory_space<vmem>>, vector<4x16x128xf32>
    tpu.vector_store %arg9[%c0_28, %c0_29, %c128_30], %19 {strides = array<i32>} : memref<4x16x384xf32, #tpu.memory_space<vmem>>, vector<4x16x128xf32>,
    %24 = vector.extract_strided_slice %19 {offsets = [0, 1, 0], sizes = [4, 15, 128], strides = [1, 1, 1]} : vector<4x16x128xf32> to vector<4x15x128xf32>
    %c0_31 = arith.constant 0 : index
    %c0_32 = arith.constant 0 : index
    %c256_33 = arith.constant 256 : index
    %25 = vector.load %arg9[%c0_31, %c0_32, %c256_33] : memref<4x16x384xf32, #tpu.memory_space<vmem>>, vector<4x15x128xf32>
    tpu.vector_store %arg9[%c0_31, %c0_32, %c256_33], %24 {strides = array<i32>} : memref<4x16x384xf32, #tpu.memory_space<vmem>>, vector<4x15x128xf32>,
    %c0_34 = arith.constant 0 : index
    %c15_35 = arith.constant 15 : index
    %c256_36 = arith.constant 256 : index
    %26 = vector.load %arg9[%c0_34, %c15_35, %c256_36] : memref<4x16x384xf32, #tpu.memory_space<vmem>>, vector<4x1x128xf32>
    tpu.vector_store %arg9[%c0_34, %c15_35, %c256_36], %1 {strides = array<i32>} : memref<4x16x384xf32, #tpu.memory_space<vmem>>, vector<4x1x128xf32>,
    %c0_37 = arith.constant 0 : index
    %c0_38 = arith.constant 0 : index
    %c0_39 = arith.constant 0 : index
    %27 = vector.load %arg9[%c0_37, %c0_38, %c0_39] : memref<4x16x384xf32, #tpu.memory_space<vmem>>, vector<4x16x384xf32>
    %28 = vector.shape_cast %27 : vector<4x16x384xf32> to vector<64x384xf32>
    %29 = arith.truncf %28 : vector<64x384xf32> to vector<64x384xbf16>
    %c0_40 = arith.constant 0 : index
    %c0_41 = arith.constant 0 : index
    %30 = vector.load %arg4[%c0_40, %c0_41] : memref<384x128xbf16, #tpu.memory_space<vmem>>, vector<384x128xbf16>
    %cst_42 = arith.constant dense<0.000000e+00> : vector<64x128xf32>
    %31 = tpu.matmul %29, %30, %cst_42 {dimension_numbers = #tpu.dot_dimension_numbers<[1], [0], [0], [1], [0, 0, 1, 1], [], []>} : vector<64x384xbf16>, vector<384x128xbf16>, vector<64x128xf32> -> vector<64x128xf32>
    %c0_43 = arith.constant 0 : index
    %c0_44 = arith.constant 0 : index
    %32 = vector.load %arg5[%c0_43, %c0_44] : memref<1x128xf32, #tpu.memory_space<vmem>>, vector<1x128xf32>
    %33 = vector.broadcast %32 : vector<1x128xf32> to vector<64x128xf32>
    %34 = arith.addf %31, %33 : vector<64x128xf32>
    %35 = vector.shape_cast %34 : vector<64x128xf32> to vector<4x16x128xf32>
    %cst_45 = arith.constant dense<0.000000e+00> : vector<4x128xf32>
    %36 = vector.multi_reduction <add>, %35, %cst_45 [1] : vector<4x16x128xf32> to vector<4x128xf32>
    %cst_46 = arith.constant 1.600000e+01 : f32
    %37 = vector.broadcast %cst_46 : f32 to vector<4x128xf32>
    %38 = arith.divf %36, %37 : vector<4x128xf32>
    %39 = arith.truncf %38 : vector<4x128xf32> to vector<4x128xbf16>
    %c0_47 = arith.constant 0 : index
    %c0_48 = arith.constant 0 : index
    %40 = vector.load %arg6[%c0_47, %c0_48] : memref<128x128xbf16, #tpu.memory_space<vmem>>, vector<128x128xbf16>
    %cst_49 = arith.constant dense<0.000000e+00> : vector<4x128xf32>
    %41 = tpu.matmul %39, %40, %cst_49 {dimension_numbers = #tpu.dot_dimension_numbers<[1], [0], [0], [1], [0, 0, 1, 1], [], []>} : vector<4x128xbf16>, vector<128x128xbf16>, vector<4x128xf32> -> vector<4x128xf32>
    %42 = arith.negf %41 : vector<4x128xf32>
    %43 = math.exp %42 : vector<4x128xf32>
    %cst_50 = arith.constant 1.000000e+00 : f32
    %44 = vector.broadcast %cst_50 : f32 to vector<4x128xf32>
    %45 = arith.addf %44, %43 : vector<4x128xf32>
    %46 = arith.divf %44, %45 : vector<4x128xf32>
    %47 = vector.shape_cast %46 : vector<4x128xf32> to vector<4x1x128xf32>
    %48 = vector.broadcast %47 : vector<4x1x128xf32> to vector<4x16x128xf32>
    %49 = arith.mulf %35, %48 : vector<4x16x128xf32>
    %50 = arith.addf %49, %0 : vector<4x16x128xf32>
    %cst_51 = arith.constant 0.000000e+00 : f32
    %51 = vector.broadcast %cst_51 : f32 to vector<4x16x128xf32>
    %52 = arith.maximumf %50, %51 : vector<4x16x128xf32>
    %c0_52 = arith.constant 0 : index
    %c0_53 = arith.constant 0 : index
    %c0_54 = arith.constant 0 : index
    %53 = vector.load %arg7[%c0_52, %c0_53, %c0_54] : memref<4x16x128xf32, #tpu.memory_space<vmem>>, vector<4x16x128xf32>
    tpu.vector_store %arg7[%c0_52, %c0_53, %c0_54], %52 {strides = array<i32>} : memref<4x16x128xf32, #tpu.memory_space<vmem>>, vector<4x16x128xf32>,
    return
  }
  func.func @transform_0(%arg0: i32) -> (i32, i32, i32) {
    %c0_i32 = arith.constant 0 : i32
    %c0_i32_0 = arith.constant 0 : i32
    %c0_i32_1 = arith.constant 0 : i32
    return %arg0, %c0_i32, %c0_i32_0 : i32, i32, i32
  }
  func.func @transform_1(%arg0: i32) -> (i32, i32) {
    %c0_i32 = arith.constant 0 : i32
    %c0_i32_0 = arith.constant 0 : i32
    %c0_i32_1 = arith.constant 0 : i32
    return %c0_i32, %c0_i32_0 : i32, i32
  }
  func.func @transform_2(%arg0: i32) -> (i32, i32) {
    %c0_i32 = arith.constant 0 : i32
    %c0_i32_0 = arith.constant 0 : i32
    %c0_i32_1 = arith.constant 0 : i32
    return %c0_i32, %c0_i32_0 : i32, i32
  }
  func.func @transform_3(%arg0: i32) -> (i32, i32) {
    %c0_i32 = arith.constant 0 : i32
    %c0_i32_0 = arith.constant 0 : i32
    %c0_i32_1 = arith.constant 0 : i32
    return %c0_i32, %c0_i32_0 : i32, i32
  }
  func.func @transform_4(%arg0: i32) -> (i32, i32) {
    %c0_i32 = arith.constant 0 : i32
    %c0_i32_0 = arith.constant 0 : i32
    %c0_i32_1 = arith.constant 0 : i32
    return %c0_i32, %c0_i32_0 : i32, i32
  }
  func.func @transform_5(%arg0: i32) -> (i32, i32) {
    %c0_i32 = arith.constant 0 : i32
    %c0_i32_0 = arith.constant 0 : i32
    %c0_i32_1 = arith.constant 0 : i32
    return %c0_i32, %c0_i32_0 : i32, i32
  }
  func.func @transform_6(%arg0: i32) -> (i32, i32, i32) {
    %c0_i32 = arith.constant 0 : i32
    %c0_i32_0 = arith.constant 0 : i32
    %c0_i32_1 = arith.constant 0 : i32
    return %arg0, %c0_i32, %c0_i32_0 : i32, i32, i32
  }
}

</mosaic_0001>

<bundles_post_ra>
// kernel: eca_basic_block.1
= control target key start
LH: loop header
LB: loop body
LE: loop exit
PB: predicated region body
PF: predicated region fallthrough
CT: control target
= control target key end

     0   :  { %s1839_s21 = smov 0   ;;  %s2170_s0 = inlined_call_operand.vmem [shape: f32[8,16,128], index: 0, kind: input, shape index: {}]   ;;  %s2171_s1 = inlined_call_operand.vmem [shape: bf16[384,128], index: 1, kind: input, shape index: {}]   ;;  %s2172_s2 = inlined_call_operand.vmem [shape: f32[1,128], index: 2, kind: input, shape index: {}]   ;;  %s2173_s3 = inlined_call_operand.vmem [shape: bf16[384,128], index: 3, kind: input, shape index: {}]   ;;  %s2174_s4 = inlined_call_operand.vmem [shape: f32[1,128], index: 4, kind: input, shape index: {}]   ;;  %s2175_s5 = inlined_call_operand.vmem [shape: bf16[128,128], index: 5, kind: input, shape index: {}]   ;;  %s2176_s6 = inlined_call_operand.vmem [shape: f32[8,16,128], index: 6, kind: output, shape index: {}]  }
   0x1 LB: > { %s1467_s22 = sadd.s32 4294967295, %s1799_s21   ;;  %p1471_p0 = scmp.ge.s32.totalorder %s1799_s21, 1  ;;  %s1799_s21 = sphi %s1839_s21, %s16_s21  }
   0x2   : > { %p214_p1 = scmp.lt.s32.totalorder %s1799_s21, 3 }
   0x4   : > { %p215_p2 = pnand %p1471_p0, %p214_p1 }
   0x5   : > { %s1472_s15 = sshll.u32 (!%p215_p2), %s1467_s22, 2 }
   0x6   : > { %218 = sbr.rel (%p215_p2) target bundleno = 755 (0x2f3), region = 44  ;;  %p247_p3 = scmp.lt.s32.totalorder (!%p215_p2), %s1472_s15, 7 }
   0xb   : > { %v1733_v0 = vld [vmem:[%s2171_s1 + $0x78] sm:$0xff]   ;;  %v1736_v3 = vld [vmem:[%s2171_s1 + $0x70] sm:$0xff]   ;;  %v1801_v4 = vmov 0.0   ;;  %v1739_v7 = vld [vmem:[%s2171_s1 + $0x68] sm:$0xff]   ;;  %s2178_s15 = smov (!%p247_p3, %s1472_s15), 7  ;;  %vm318_vm0 = vcmask 1046528  }
   0xc   : > { %v1734_v1 = vld [vmem:[%s2171_s1 + $0xb8] sm:$0xff]   ;;  %1541 = vmatprep.subr.bf16.mxu0 %v1733_v0  ;;  %347 = vst [vmem:[#allocation2 + $0x2f] sm:$0x1] %v1801_v4  ;;  %269 = vst [vmem:[#allocation2] sm:$0x1] %v1801_v4  ;;  %v1737_v5 = vld [vmem:[%s2171_s1 + $0xb0] sm:$0xff]  }
   0xd   : > { %v1735_v2 = vld [vmem:[%s2171_s1 + $0x38] sm:$0xff]   ;;  %1654 = vmatprep.subr.bf16.mxu1 %v1734_v1  ;;  %270 = vst [vmem:[#allocation2 + $0x30] sm:$0x1] %v1801_v4  ;;  %271 = vst [vmem:[#allocation2 + $0x60] sm:$0x1] %v1801_v4  ;;  %v1738_v6 = vld [vmem:[%s2171_s1 + $0x30] sm:$0xff]  }
   0xe   : > { %272 = vst [vmem:[#allocation2 + $0x90] sm:$0x1] %v1801_v4  ;;  %348 = vst [vmem:[#allocation2 + $0x5f] sm:$0x1] %v1801_v4  ;;  %1542 = vmatpush3.bf16.msra.mxu0 %v1735_v2  ;;  %1655 = vmatpush3.bf16.msra.mxu1 %v1734_v1  ;;  %v1740_v8 = vld [vmem:[%s2171_s1 + $0xa8] sm:$0xff]   ;;  %v1742_v10 = vld [vmem:[%s2171_s1 + $0x60] sm:$0xff]  }
   0xf   : > { %349 = vst [vmem:[#allocation2 + $0x8f] sm:$0x1] %v1801_v4  ;;  %350 = vst [vmem:[#allocation2 + $0xbf] sm:$0x1] %v1801_v4  ;;  %1543 = vmatprep.subr.bf16.mxu0 %v1736_v3  ;;  %1656 = vmatprep.subr.bf16.mxu1 %v1737_v5  ;;  %v1741_v9 = vld [vmem:[%s2171_s1 + $0x28] sm:$0xff]   ;;  %v1743_v11 = vld [vmem:[%s2171_s1 + $0xa0] sm:$0xff]  }
  0x10   : > { %724 = vst [vmem:[#allocation3] sm:$0x1] %v1801_v4  ;;  %725 = vst [vmem:[#allocation3 + $0x30] sm:$0x1] %v1801_v4  ;;  %v1744_v12 = vld [vmem:[%s2171_s1 + $0x20] sm:$0xff]   ;;  %v1745_v13 = vld [vmem:[%s2171_s1 + $0x58] sm:$0xff]  }
  0x11   : > { %726 = vst [vmem:[#allocation3 + $0x60] sm:$0x1] %v1801_v4  ;;  %727 = vst [vmem:[#allocation3 + $0x90] sm:$0x1] %v1801_v4  ;;  %v1746_v14 = vld [vmem:[%s2171_s1 + $0x98] sm:$0xff]   ;;  %v1748_v16 = vld [vmem:[%s2171_s1 + $0x50] sm:$0xff]  }
  0x12   : > { %800 = vst [vmem:[#allocation3 + $0x2f] sm:$0x1] %v1801_v4  ;;  %801 = vst [vmem:[#allocation3 + $0x5f] sm:$0x1] %v1801_v4  ;;  %1544 = vmatpush3.bf16.msra.mxu0 %v1738_v6  ;;  %1657 = vmatpush3.bf16.msra.mxu1 %v1737_v5  ;;  %v1747_v15 = vld [vmem:[%s2171_s1 + $0x18] sm:$0xff]   ;;  %v1749_v17 = vld [vmem:[%s2171_s1 + $0x90] sm:$0xff]  }
  0x13   : > { %802 = vst [vmem:[#allocation3 + $0x8f] sm:$0x1] %v1801_v4  ;;  %803 = vst [vmem:[#allocation3 + $0xbf] sm:$0x1] %v1801_v4  ;;  %1545 = vmatprep.subr.bf16.mxu0 %v1739_v7  ;;  %1658 = vmatprep.subr.bf16.mxu1 %v1740_v8  ;;  %s1539_s11 = sshll.u32 %s2178_s15, 4  ;;  %v1750_v18 = vld [vmem:[%s2171_s1 + $0x10] sm:$0xff]  }
  0x14   : > { %v1751_v19 = vld [vmem:[%s2171_s1 + $0x48] sm:$0xff]   ;;  %s251_s23 = scalar_lea.vmem %s2170_s0, %s1539_s11  ;;  %v1754_v22 = vld [vmem:[%s2171_s1 + $0x40] sm:$0xff]   ;;  %vm281_vm1 = vcmask 1040384   ;;  %v1757_v44 = vld [vmem:[%s2173_s3 + $0x78] sm:$0xff]   ;;  %vm1802_vm2 = vmmov 0   ;;  %vm1230_vm3 = vcmask 1041409   ;;  %s258_s16 = scalar_lea.vmem %s2176_s6, %s1539_s11 }
  0x15   : > { %v1752_v20 = vld [vmem:[%s2171_s1 + $0x88] sm:$0xff]   ;;  %v1755_v23 = vld [vmem:[%s2171_s1 + $0x80] sm:$0xff]   ;;  %v1946_v26 = vld [vmem:[%s251_s23 + $0x10] sm:$0xff]  ;;  %vm1232_vm4 = vcmask 1042434   ;;  %vm1234_vm5 = vcmask 1043459  }
  0x16   : > { %1546 = vmatpush3.bf16.msra.mxu0 %v1741_v9  ;;  %1659 = vmatpush3.bf16.msra.mxu1 %v1740_v8  ;;  %v1753_v21 = vld [vmem:[%s2171_s1 + $0x8] sm:$0xff]   ;;  %v1942_v24 = vld [vmem:[%s251_s23] sm:$0xff]  ;;  %v1953_v31 = vld [vmem:[%s251_s23 + $0x18] sm:$0xff]  ;;  %v322_v36 = vrot.slane %v1946_v26, 1  ;;  %v285_v41 = vrot.slane %v1946_v26, 7 }
  0x17   : > { %1547 = vmatprep.subr.bf16.mxu0 %v1742_v10  ;;  %1660 = vmatprep.subr.bf16.mxu1 %v1743_v11  ;;  %v1944_v25 = vld [vmem:[%s251_s23 + $0x8] sm:$0xff]  ;;  %v319_v29 = vrot.slane %v1942_v24, 1  ;;  %v1955_v32 = vld [vmem:[%s251_s23 + $0x20] sm:$0xff]  ;;  %v282_v35 = vrot.slane %v1942_v24, 7  ;;  %v323_v37 = vrot.slane %v1953_v31, 1  ;;  %v1965_v38 = vld [vmem:[%s251_s23 + $0x30] sm:$0xff]  ;;  %v379_v0 = vpack.c.bf16 %v1953_v31, %v1946_v26 }
  0x18   : > { %v283_v27 = vrot.slane %v1944_v25, 7  ;;  %v376_v28 = vpack.c.bf16 %v1944_v25, %v1942_v24  ;;  %v320_v30 = vrot.slane %v1944_v25, 1  ;;  %v1957_v33 = vld [vmem:[%s251_s23 + $0x28] sm:$0xff]  ;;  %v1756_v34 = vld [vmem:[%s2171_s1] sm:$0xff]   ;;  %v1967_v39 = vld [vmem:[%s251_s23 + $0x38] sm:$0xff]  ;;  %v286_v42 = vrot.slane %v1953_v31, 7 }
  0x19   : > { %v325_v43 = vrot.slane %v1955_v32, 1  ;;  %302 = vst [vmem:[#allocation2] sm:$0xfe] %v282_v35  ;;  %v324_v46 = vsel %vm318_vm0, %v322_v36, %v323_v37  ;;  %342 = vst [vmem:[#allocation2 + $0x58] sm:$0x7f] %v323_v37  ;;  %v326_v47 = vrot.slane %v1957_v33, 1 }
  0x1a   : > { %1548 = vmatpush3.bf16.msra.mxu0 %v1744_v12  ;;  %1661 = vmatpush3.bf16.msra.mxu1 %v1743_v11  ;;  %v321_v40 = vsel %vm318_vm0, %v319_v29, %v320_v30  ;;  %340 = vst [vmem:[#allocation2 + $0x28] sm:$0x7f] %v320_v30  ;;  %v284_v45 = vsel %vm281_vm1, %v282_v35, %v283_v27  ;;  %v328_v48 = vrot.slane %v1965_v38, 1  ;;  %304 = vst [vmem:[#allocation2 + $0x30] sm:$0xfe] %v285_v41  ;;  %v1758_v59 = vld [vmem:[%s2173_s3 + $0x38] sm:$0xff]  }
  0x1b   : > { %1549 = vmatprep.subr.bf16.mxu0 %v1745_v13  ;;  %1662 = vmatprep.subr.bf16.mxu1 %v1746_v14  ;;  %v287_v49 = vsel %vm281_vm1, %v285_v41, %v286_v42  ;;  %v329_v50 = vrot.slane %v1967_v39, 1  ;;  %v288_v51 = vrot.slane %v1955_v32, 7  ;;  %v327_v52 = vsel %vm318_vm0, %v325_v43, %v326_v47  ;;  %344 = vst [vmem:[#allocation2 + $0x88] sm:$0x7f] %v326_v47  ;;  %v1759_v3 = vld [vmem:[%s2173_s3 + $0x70] sm:$0xff]   ;;  %v1767_v27 = vld [vmem:[%s2173_s3 + $0x58] sm:$0xff]  }
  0x1c   : > { %618 = vmatprep.mubr.bf16.mxu0 %v376_v28  ;;  %v289_v53 = vrot.slane %v1957_v33, 7  ;;  %v291_v54 = vrot.slane %v1965_v38, 7  ;;  %v292_v56 = vrot.slane %v1967_v39, 7  ;;  %v382_v11 = vpack.c.bf16 %v1957_v33, %v1955_v32  ;;  %v1768_v28 = vld [vmem:[%s2173_s3 + $0x18] sm:$0xff]   ;;  %v1769_v29 = vld [vmem:[%s2173_s3 + $0xa8] sm:$0xff]   ;;  %v1770_v30 = vld [vmem:[%s2173_s3 + $0x50] sm:$0xff]  }
  0x1d   : > { %v330_v55 = vsel %vm318_vm0, %v328_v48, %v329_v50  ;;  %346 = vst [vmem:[#allocation2 + $0xb8] sm:$0x7f] %v329_v50  ;;  %306 = vst [vmem:[#allocation2 + $0x60] sm:$0xfe] %v288_v51  ;;  %v1772_v35 = vld [vmem:[%s2173_s3 + $0xa0] sm:$0xff]   ;;  %v1773_v36 = vld [vmem:[%s2173_s3 + $0x48] sm:$0xff]  }
  0x1e   : > { %1550 = vmatpush3.bf16.msra.mxu0 %v1747_v15  ;;  %1663 = vmatpush3.bf16.msra.mxu1 %v1746_v14  ;;  %v290_v57 = vsel %vm281_vm1, %v288_v51, %v289_v53  ;;  %308 = vst [vmem:[#allocation2 + $0x90] sm:$0xfe] %v291_v54  ;;  %v293_v58 = vsel %vm281_vm1, %v291_v54, %v292_v56  ;;  %v1774_v37 = vld [vmem:[%s2173_s3 + $0x8] sm:$0xff]   ;;  %v1776_v41 = vld [vmem:[%s2173_s3 + $0x40] sm:$0xff]   ;;  %v1778_v43 = vld [vmem:[%s2173_s3 + $0x90] sm:$0xff]  }
  0x1f   : > { %1551 = vmatprep.subr.bf16.mxu0 %v1748_v16  ;;  %1664 = vmatprep.subr.bf16.mxu1 %v1749_v17  ;;  %v385_v14 = vpack.c.bf16 %v1967_v39, %v1965_v38  ;;  %v1777_v42 = vld [vmem:[%s2173_s3] sm:$0xff]  }
  0x20   : > { %v351_v62 = vld [vmem:[#allocation2] sm:$0xff]  ;;  %v362_v63 = vld [vmem:[#allocation2 + $0x58] sm:$0xff] }
  0x21   : > { %v356_v60 = vld [vmem:[#allocation2 + $0x28] sm:$0xff]  ;;  %v375_v1 = vpack.c.bf16 %v284_v45, %v351_v62  ;;  %v380_v2 = vpack.c.bf16 %v362_v63, %v324_v46  ;;  %v357_v6 = vld [vmem:[#allocation2 + $0x30] sm:$0xff]  ;;  %v1780_v45 = vld [vmem:[%s2173_s3 + $0x80] sm:$0xff]  }
  0x22   : > { %1552 = vmatpush3.bf16.msra.mxu0 %v1750_v18  ;;  %1665 = vmatpush3.bf16.msra.mxu1 %v1749_v17  ;;  %v377_v61 = vpack.c.bf16 %v356_v60, %v321_v40  ;;  %v368_v5 = vld [vmem:[#allocation2 + $0x88] sm:$0xff]  ;;  %v378_v9 = vpack.c.bf16 %v287_v49, %v357_v6  ;;  %v1760_v17 = vld [vmem:[%s2173_s3 + $0x30] sm:$0xff]   ;;  %v1775_v40 = vld [vmem:[%s2173_s3 + $0x98] sm:$0xff]  }
  0x23   : > { %1553 = vmatprep.subr.bf16.mxu0 %v1751_v19  ;;  %1666 = vmatprep.subr.bf16.mxu1 %v1752_v20  ;;  %v383_v7 = vpack.c.bf16 %v368_v5, %v327_v52  ;;  %v1761_v18 = vld [vmem:[%s2173_s3 + $0x68] sm:$0xff]   ;;  %v2069_v49 = vld [vmem:[%s2172_s2] ss:$0 sm:$0xff] }
  0x24   : > { %1670 = vmatprep.mubr.bf16.mxu1 %v377_v61  ;;  %v374_v8 = vld [vmem:[#allocation2 + $0xb8] sm:$0xff]  ;;  %v363_v12 = vld [vmem:[#allocation2 + $0x60] sm:$0xff]  ;;  %v1762_v19 = vld [vmem:[%s2173_s3 + $0x28] sm:$0xff]  }
  0x25   : > { %v386_v10 = vpack.c.bf16 %v374_v8, %v330_v55  ;;  %v381_v13 = vpack.c.bf16 %v290_v57, %v363_v12  ;;  %v369_v15 = vld [vmem:[#allocation2 + $0x90] sm:$0xff] }
  0x26   : > { %1554 = vmatpush3.bf16.msra.mxu0 %v1753_v21  ;;  %1667 = vmatpush3.bf16.msra.mxu1 %v1752_v20  ;;  %v384_v16 = vpack.c.bf16 %v293_v58, %v369_v15  ;;  %v1763_v20 = vld [vmem:[%s2173_s3 + $0xb8] sm:$0xff]   ;;  %v1764_v21 = vld [vmem:[%s2173_s3 + $0x60] sm:$0xff]  }
  0x27   : > { %1555 = vmatprep.subr.bf16.mxu0 %v1754_v22  ;;  %1668 = vmatprep.subr.bf16.mxu1 %v1755_v23  ;;  %v1765_v22 = vld [vmem:[%s2173_s3 + $0x20] sm:$0xff]  }
  0x2a   : > { %1556 = vmatpush3.bf16.msra.mxu0 %v1756_v34  ;;  %1669 = vmatpush3.bf16.msra.mxu1 %v1755_v23  ;;  %v1766_v23 = vld [vmem:[%s2173_s3 + $0xb0] sm:$0xff]  }
  0x2b   : > { %1593 = vmatprep.subr.bf16.mxu0 %v1757_v44  ;;  %1678 = vmatprep.subr.bf16.mxu1 %v1763_v20  ;;  %v1771_v34 = vld [vmem:[%s2173_s3 + $0x10] sm:$0xff]   ;;  %v1779_v44 = vld [vmem:[%s2173_s3 + $0x88] sm:$0xff]  }
  0x2d   : > { %619 = vmatmul.mubr.bf16.vlgmr.msra.gmra.mxu0 %v375_v1  ;;  %1671 = vmatmul.mubr.bf16.vlgmr.msra.gmra.mxu1 %v380_v2 }
  0x2e   : > { %626 = vmatprep.mubr.bf16.mxu0 %v379_v0  ;;  %1594 = vmatpush3.bf16.msra.mxu0 %v1758_v59 }
  0x2f   : > { %1674 = vmatprep.mubr.bf16.mxu1 %v383_v7  ;;  %1595 = vmatprep.subr.bf16.mxu0 %v1759_v3 }
  0x30   : > { %1679 = vmatpush3.bf16.msra.mxu1 %v1763_v20 }
  0x31   : > { %1680 = vmatprep.subr.bf16.mxu1 %v1766_v23 }
  0x32   : > { %1596 = vmatpush3.bf16.msra.mxu0 %v1760_v17 }
  0x33   : > { %1597 = vmatprep.subr.bf16.mxu0 %v1761_v18 }
  0x34   : > { %1681 = vmatpush3.bf16.msra.mxu1 %v1766_v23 }
  0x35   : > { %627 = vmatmul.mubr.bf16.gmra.mxu0 %v378_v9  ;;  %1675 = vmatmul.mubr.bf16.gmra.mxu1 %v386_v10 }
  0x36   : > { %634 = vmatprep.mubr.bf16.mxu0 %v382_v11  ;;  %1598 = vmatpush3.bf16.msra.mxu0 %v1762_v19 }
  0x37   : > { %1599 = vmatprep.subr.bf16.mxu0 %v1764_v21  ;;  %1682 = vmatprep.subr.bf16.mxu1 %v1769_v29 }
  0x38   : > { %1683 = vmatpush3.bf16.msra.mxu1 %v1769_v29 }
  0x39   : > { %1684 = vmatprep.subr.bf16.mxu1 %v1772_v35 }
  0x3a   : > { %1600 = vmatpush3.bf16.msra.mxu0 %v1765_v22 }
  0x3b   : > { %1601 = vmatprep.subr.bf16.mxu0 %v1767_v27 }
  0x3c   : > { %1685 = vmatpush3.bf16.msra.mxu1 %v1772_v35 }
  0x3d   : > { %635 = vmatmul.mubr.bf16.gmra.mxu0 %v381_v13  ;;  %1686 = vmatprep.subr.bf16.mxu1 %v1775_v40 }
  0x3e   : > { %642 = vmatprep.mubr.bf16.mxu0 %v385_v14  ;;  %1602 = vmatpush3.bf16.msra.mxu0 %v1768_v28 }
  0x3f   : > { %1603 = vmatprep.subr.bf16.mxu0 %v1770_v30 }
  0x40   : > { %1687 = vmatpush3.bf16.msra.mxu1 %v1775_v40 }
  0x41   : > { %1688 = vmatprep.subr.bf16.mxu1 %v1778_v43 }
  0x42   : > { %1604 = vmatpush3.bf16.msra.mxu0 %v1771_v34 }
  0x43   : > { %1605 = vmatprep.subr.bf16.mxu0 %v1773_v36 }
  0x44   : > { %1689 = vmatpush3.bf16.msra.mxu1 %v1778_v43 }
  0x45   : > { %643 = vmatmul.mubr.bf16.gmra.mxu0 %v384_v16  ;;  %1690 = vmatprep.subr.bf16.mxu1 %v1779_v44 }
  0x46   : > { %1606 = vmatpush3.bf16.msra.mxu0 %v1774_v37 }
  0x47   : > { %1607 = vmatprep.subr.bf16.mxu0 %v1776_v41 }
  0x48   : > { %1691 = vmatpush3.bf16.msra.mxu1 %v1779_v44 }
  0x49   : > { %1692 = vmatprep.subr.bf16.mxu1 %v1780_v45 }
  0x4a   : > { %1608 = vmatpush3.bf16.msra.mxu0 %v1777_v42 }
  0x4b   : > { %1702 = vmatprep.subr.bf16.mxu0 %v1801_v4 }
  0x4c   : > { %1693 = vmatpush3.bf16.msra.mxu1 %v1780_v45 }
  0xed   : > { %v1557_v46 = vpop.f32.mrf.mxu0  ;;  %v1672_v47 = vpop.f32.mrf.mxu1 }
  0xef   : > { %v1558_v48 = vpop.f32.mrf.mxu0  ;;  %v685_v50 = vpop.f32.mrf.mxu1 }
  0xf0   : > { %v1559_v51 = vadd.f32 %v1558_v48, %v1557_v46 }
  0xf1   : > { %v1560_v52 = vpop.f32.mrf.mxu0  ;;  %v1673_v54 = vpop.f32.mrf.mxu1 }
  0xf2   : > { %v621_v53 = vadd.f32 %v1559_v51, %v2069_v49 }
  0xf3   : > { %v1561_v55 = vpop.f32.mrf.mxu0  ;;  %v688_v61 = vpop.f32.mrf.mxu1 }
  0xf4   : > { %v686_v56 = vadd.f32 %v685_v50, %v621_v53  ;;  %v1562_v57 = vadd.f32 %v1561_v55, %v1560_v52 }
  0xf5   : > { %v1563_v58 = vpop.f32.mrf.mxu0  ;;  %v1676_v8 = vpop.f32.mrf.mxu1 }
  0xf6   : > { %v716_v59 = vmax.f32 %v686_v56, 0.0  ;;  %v624_v60 = vadd.f32 %v1562_v57, %v2069_v49 }
  0xf7   : > { %v1564_v62 = vpop.f32.mrf.mxu0  ;;  %v701_v19 = vpop.f32.mrf.mxu1 }
  0xf8   : > { %v736_v63 = vrot.slane %v716_v59, 7  ;;  %v689_v0 = vadd.f32 %v688_v61, %v624_v60  ;;  %v1565_v1 = vadd.f32 %v1564_v62, %v1563_v58  ;;  %v772_v6 = vrot.slane %v716_v59, 1 }
  0xf9   : > { %v1566_v2 = vpop.f32.mrf.mxu0  ;;  %v1677_v36 = vpop.f32.mrf.mxu1 }
  0xfa   : > { %756 = vst [vmem:[#allocation3] sm:$0xfe] %v736_v63  ;;  %v717_v3 = vmax.f32 %v689_v0, 0.0  ;;  %v629_v5 = vadd.f32 %v1565_v1, %v2069_v49 }
  0xfb   : > { %v1567_v7 = vpop.f32.mrf.mxu0  ;;  %v704_v52 = vpop.f32.mrf.mxu1 }
  0xfc   : > { %v737_v9 = vrot.slane %v717_v3, 7  ;;  %v773_v10 = vrot.slane %v717_v3, 1  ;;  %v694_v11 = vadd.f32 %v1672_v47, %v629_v5  ;;  %v1568_v12 = vadd.f32 %v1567_v7, %v1566_v2 }
  0xfd   : > { %v1569_v13 = vpop.f32.mrf.mxu0  ;;  %v829_v14 = vpack.c.bf16 %v717_v3, %v716_v59 }
  0xfe   : > { %v738_v15 = vsel %vm281_vm1, %v736_v63, %v737_v9  ;;  %v774_v16 = vsel %vm318_vm0, %v772_v6, %v773_v10  ;;  %793 = vst [vmem:[#allocation3 + $0x28] sm:$0x7f] %v773_v10  ;;  %v718_v17 = vmax.f32 %v694_v11, 0.0  ;;  %v632_v18 = vadd.f32 %v1568_v12, %v2069_v49 }
  0xff   : > { %v1570_v20 = vpop.f32.mrf.mxu0  ;;  %1071 = vmatprep.mubr.bf16.mxu0 %v829_v14 }
 0x100   : > { %v739_v21 = vrot.slane %v718_v17, 7  ;;  %v697_v22 = vadd.f32 %v1673_v54, %v632_v18  ;;  %v1571_v23 = vadd.f32 %v1570_v20, %v1569_v13  ;;  %v775_v35 = vrot.slane %v718_v17, 1 }
 0x101   : > { %v1572_v27 = vpop.f32.mrf.mxu0  ;;  %v804_v28 = vld [vmem:[#allocation3] sm:$0xff] }
 0x102   : > { %758 = vst [vmem:[#allocation3 + $0x30] sm:$0xfe] %v739_v21  ;;  %v719_v29 = vmax.f32 %v697_v22, 0.0  ;;  %v637_v30 = vadd.f32 %v1571_v23, %v2069_v49  ;;  %v828_v34 = vpack.c.bf16 %v738_v15, %v804_v28 }
 0x103   : > { %v1573_v37 = vpop.f32.mrf.mxu0 }
 0x104   : > { %v740_v40 = vrot.slane %v719_v29, 7  ;;  %v776_v41 = vrot.slane %v719_v29, 1  ;;  %v702_v42 = vadd.f32 %v701_v19, %v637_v30  ;;  %v1574_v43 = vadd.f32 %v1573_v37, %v1572_v27  ;;  %1072 = vmatmul.mubr.bf16.vlgmr.msra.gmra.mxu0 %v828_v34  ;;  %v1783_v37 = vld [vmem:[%s2175_s5 + $0x28] sm:$0xff]  }
 0x105   : > { %v1575_v44 = vpop.f32.mrf.mxu0  ;;  %v809_v45 = vld [vmem:[#allocation3 + $0x28] sm:$0xff]  ;;  %v832_v46 = vpack.c.bf16 %v719_v29, %v718_v17 }
 0x106   : > { %v741_v47 = vsel %vm281_vm1, %v739_v21, %v740_v40  ;;  %v777_v48 = vsel %vm318_vm0, %v775_v35, %v776_v41  ;;  %795 = vst [vmem:[#allocation3 + $0x58] sm:$0x7f] %v776_v41  ;;  %v720_v50 = vmax.f32 %v702_v42, 0.0  ;;  %v640_v51 = vadd.f32 %v1574_v43, %v2069_v49  ;;  %v1781_v35 = vld [vmem:[%s2175_s5 + $0x38] sm:$0xff]   ;;  %v1784_v40 = vld [vmem:[%s2175_s5 + $0x20] sm:$0xff]   ;;  %v1786_v42 = vld [vmem:[%s2175_s5 + $0x10] sm:$0xff]  }
 0x107   : > { %v1576_v53 = vpop.f32.mrf.mxu0  ;;  %v830_v54 = vpack.c.bf16 %v809_v45, %v774_v16  ;;  %1079 = vmatprep.mubr.bf16.mxu0 %v832_v46  ;;  %1703 = vmatpush3.bf16.msra.mxu0 %v1781_v35  ;;  %v1785_v41 = vld [vmem:[%s2175_s5 + $0x18] sm:$0xff]   ;;  %v1787_v43 = vld [vmem:[%s2175_s5 + $0x8] sm:$0xff]  }
 0x108   : > { %v742_v55 = vrot.slane %v720_v50, 7  ;;  %v705_v56 = vadd.f32 %v704_v52, %v640_v51  ;;  %v1577_v57 = vadd.f32 %v1576_v53, %v1575_v44  ;;  %v778_v63 = vrot.slane %v720_v50, 1  ;;  %1704 = vmatprep.subr.bf16.mxu0 %v1801_v4  ;;  %v1788_v44 = vld [vmem:[%s2175_s5] sm:$0xff]  }
 0x109   : > { %v1578_v58 = vpop.f32.mrf.mxu0  ;;  %1694 = vmatprep.mubr.bf16.mxu1 %v830_v54  ;;  %v810_v59 = vld [vmem:[#allocation3 + $0x30] sm:$0xff] }
 0x10a   : > { %760 = vst [vmem:[#allocation3 + $0x60] sm:$0xfe] %v742_v55  ;;  %v721_v60 = vmax.f32 %v705_v56, 0.0  ;;  %v645_v61 = vadd.f32 %v1577_v57, %v2069_v49  ;;  %v831_v62 = vpack.c.bf16 %v741_v47, %v810_v59  ;;  %v1503_v57 = vld [vmem:[%s2174_s4] ss:$0 sm:$0xff] }
 0x10b   : > { %v1579_v0 = vpop.f32.mrf.mxu0 }
 0x10c   : > { %v743_v1 = vrot.slane %v721_v60, 7  ;;  %v779_v2 = vrot.slane %v721_v60, 1  ;;  %v710_v3 = vadd.f32 %v1676_v8, %v645_v61  ;;  %v1580_v5 = vadd.f32 %v1579_v0, %v1578_v58  ;;  %1080 = vmatmul.mubr.bf16.gmra.mxu0 %v831_v62 }
 0x10d   : > { %v815_v6 = vld [vmem:[#allocation3 + $0x58] sm:$0xff]  ;;  %v835_v7 = vpack.c.bf16 %v721_v60, %v720_v50 }
 0x10e   : > { %v744_v9 = vsel %vm281_vm1, %v742_v55, %v743_v1  ;;  %v780_v10 = vsel %vm318_vm0, %v778_v63, %v779_v2  ;;  %797 = vst [vmem:[#allocation3 + $0x88] sm:$0x7f] %v779_v2  ;;  %v722_v11 = vmax.f32 %v710_v3, 0.0  ;;  %v648_v12 = vadd.f32 %v1580_v5, %v2069_v49 }
 0x10f   : > { %v833_v13 = vpack.c.bf16 %v815_v6, %v777_v48  ;;  %1087 = vmatprep.mubr.bf16.mxu0 %v835_v7 }
 0x110   : > { %v745_v14 = vrot.slane %v722_v11, 7  ;;  %v713_v15 = vadd.f32 %v1677_v36, %v648_v12  ;;  %v781_v18 = vrot.slane %v722_v11, 1  ;;  %v1782_v36 = vld [vmem:[%s2175_s5 + $0x30] sm:$0xff]  }
 0x111   : > { %1695 = vmatmul.mubr.bf16.vlgmr.msra.gmra.mxu1 %v833_v13  ;;  %v816_v16 = vld [vmem:[#allocation3 + $0x60] sm:$0xff]  ;;  %1705 = vmatpush3.bf16.msra.mxu0 %v1782_v36 }
 0x112   : > { %762 = vst [vmem:[#allocation3 + $0x90] sm:$0xfe] %v745_v14  ;;  %v723_v8 = vmax.f32 %v713_v15, 0.0  ;;  %v834_v17 = vpack.c.bf16 %v744_v9, %v816_v16  ;;  %1706 = vmatprep.subr.bf16.mxu0 %v1801_v4 }
 0x114   : > { %v746_v19 = vrot.slane %v723_v8, 7  ;;  %v782_v20 = vrot.slane %v723_v8, 1  ;;  %1088 = vmatmul.mubr.bf16.gmra.mxu0 %v834_v17  ;;  %v838_v21 = vpack.c.bf16 %v723_v8, %v722_v11 }
 0x115   : > { %v821_v22 = vld [vmem:[#allocation3 + $0x88] sm:$0xff]  ;;  %1707 = vmatpush3.bf16.msra.mxu0 %v1783_v37 }
 0x116   : > { %v747_v23 = vsel %vm281_vm1, %v745_v14, %v746_v19  ;;  %v783_v27 = vsel %vm318_vm0, %v781_v18, %v782_v20  ;;  %799 = vst [vmem:[#allocation3 + $0xb8] sm:$0x7f] %v782_v20  ;;  %v836_v49 = vpack.c.bf16 %v821_v22, %v780_v10  ;;  %1095 = vmatprep.mubr.bf16.mxu0 %v838_v21 }
 0x117   : > { %1708 = vmatprep.subr.bf16.mxu0 %v1801_v4 }
 0x118   : > { %1698 = vmatprep.mubr.bf16.mxu1 %v836_v49 }
 0x119   : > { %v822_v28 = vld [vmem:[#allocation3 + $0x90] sm:$0xff]  ;;  %1709 = vmatpush3.bf16.msra.mxu0 %v1784_v40 }
 0x11a   : > { %v837_v29 = vpack.c.bf16 %v747_v23, %v822_v28  ;;  %1710 = vmatprep.subr.bf16.mxu0 %v1801_v4 }
 0x11c   : > { %1096 = vmatmul.mubr.bf16.gmra.mxu0 %v837_v29 }
 0x11d   : > { %v827_v30 = vld [vmem:[#allocation3 + $0xb8] sm:$0xff]  ;;  %1711 = vmatpush3.bf16.msra.mxu0 %v1785_v41  ;;  %1718 = vmatprep.mubr.msk.bf16.mxu0 %vm1802_vm2, %v1801_v4 }
 0x11e   : > { %v839_v34 = vpack.c.bf16 %v827_v30, %v783_v27  ;;  %1712 = vmatprep.subr.bf16.mxu0 %v1801_v4 }
 0x120   : > { %1699 = vmatmul.mubr.bf16.gmra.mxu1 %v839_v34 }
 0x121   : > { %1713 = vmatpush3.bf16.msra.mxu0 %v1786_v42 }
 0x122   : > { %1714 = vmatprep.subr.bf16.mxu0 %v1801_v4 }
 0x125   : > { %1715 = vmatpush3.bf16.msra.mxu0 %v1787_v43 }
 0x126   : > { %1716 = vmatprep.subr.bf16.mxu0 %v1801_v4 }
 0x129   : > { %1717 = vmatpush3.bf16.msra.mxu0 %v1788_v44 }
 0x1c4   : > { %v1609_v45 = vpop.f32.mrf.mxu0 }
 0x1c6   : > { %v1610_v46 = vpop.f32.mrf.mxu0 }
 0x1c7   : > { %v1611_v55 = vadd.f32 %v1610_v46, %v1609_v45 }
 0x1c8   : > { %v1612_v47 = vpop.f32.mrf.mxu0 }
 0x1c9   : > { %v1074_v0 = vadd.f32 %v1611_v55, %v1503_v57 }
 0x1ca   : > { %v1613_v48 = vpop.f32.mrf.mxu0 }
 0x1cb   : > { %v1614_v56 = vadd.f32 %v1613_v48, %v1612_v47 }
 0x1cc   : > { %v1615_v50 = vpop.f32.mrf.mxu0 }
 0x1cd   : > { %v1077_v1 = vadd.f32 %v1614_v56, %v1503_v57 }
 0x1ce   : > { %v1616_v51 = vpop.f32.mrf.mxu0 }
 0x1cf   : > { %v1617_v52 = vadd.f32 %v1616_v51, %v1615_v50 }
 0x1d0   : > { %v1618_v53 = vpop.f32.mrf.mxu0 }
 0x1d1   : > { %v1696_v54 = vpop.f32.mrf.mxu1  ;;  %v1082_v59 = vadd.f32 %v1617_v52, %v1503_v57 }
 0x1d2   : > { %v1619_v58 = vpop.f32.mrf.mxu0 }
 0x1d3   : > { %v1138_v60 = vpop.f32.mrf.mxu1  ;;  %v1620_v4 = vadd.f32 %v1619_v58, %v1618_v53  ;;  %v2122_v3 = vadd.f32 %v1696_v54, %v1082_v59 }
 0x1d4   : > { %v1621_v61 = vpop.f32.mrf.mxu0  ;;  %v2126_v7 = vadd.f32 %v1138_v60, %v1074_v0 }
 0x1d5   : > { %v1697_v62 = vpop.f32.mrf.mxu1  ;;  %v1085_v63 = vadd.f32 %v1620_v4, %v1503_v57 }
 0x1d6   : > { %v1622_v2 = vpop.f32.mrf.mxu0 }
 0x1d7   : > { %v2124_v5 = vadd.f32 %v1697_v62, %v1085_v63  ;;  %v1141_v6 = vpop.f32.mrf.mxu1  ;;  %v1623_v27 = vadd.f32 %v1622_v2, %v1621_v61 }
 0x1d8   : > { %v2128_v9 = vadd.f32 %v1141_v6, %v1077_v1  ;;  %v1624_v10 = vpop.f32.mrf.mxu0 }
 0x1d9   : > { %v1176_v11 = vadd.f32 %v2124_v5, %v2122_v3  ;;  %v1090_v40 = vadd.f32 %v1623_v27, %v1503_v57 }
 0x1da   : > { %v1169_v12 = vadd.f32 %v2128_v9, %v2126_v7  ;;  %v1625_v13 = vpop.f32.mrf.mxu0 }
 0x1db   : > { %v1177_v14 = vrot.slane %v1176_v11, 4  ;;  %v1626_v49 = vadd.f32 %v1625_v13, %v1624_v10 }
 0x1dc   : > { %v1170_v15 = vrot.slane %v1169_v12, 4  ;;  %v1627_v16 = vpop.f32.mrf.mxu0 }
 0x1dd   : > { %v1178_v8 = vadd.f32 %v1177_v14, %v1176_v11  ;;  %v1093_v42 = vadd.f32 %v1626_v49, %v1503_v57 }
 0x1de   : > { %v1171_v17 = vadd.f32 %v1170_v15, %v1169_v12  ;;  %v1628_v18 = vpop.f32.mrf.mxu0 }
 0x1df   : > { %v1629_v19 = vadd.f32 %v1628_v18, %v1627_v16  ;;  %v1179_v20 = vrot.slane %v1178_v8, 2 }
 0x1e0   : > { %v1172_v21 = vrot.slane %v1171_v17, 2  ;;  %v1700_v22 = vpop.f32.mrf.mxu1  ;;  %v1630_v23 = vpop.f32.mrf.mxu0 }
 0x1e1   : > { %v1098_v30 = vadd.f32 %v1629_v19, %v1503_v57  ;;  %v1180_v35 = vadd.f32 %v1179_v20, %v1178_v8 }
 0x1e2   : > { %v1154_v28 = vpop.f32.mrf.mxu1  ;;  %v1631_v29 = vpop.f32.mrf.mxu0  ;;  %v1173_v36 = vadd.f32 %v1172_v21, %v1171_v17 }
 0x1e3   : > { %v1632_v34 = vadd.f32 %v1631_v29, %v1630_v23  ;;  %v2134_v44 = vadd.f32 %v1700_v22, %v1098_v30  ;;  %v2136_v45 = vadd.f32 %v1154_v28, %v1090_v40  ;;  %v1181_v48 = vrot.slane %v1180_v35, 1 }
 0x1e4   : > { %v1701_v37 = vpop.f32.mrf.mxu1  ;;  %v1174_v50 = vrot.slane %v1173_v36, 1 }
 0x1e5   : > { %v1101_v41 = vadd.f32 %v1632_v34, %v1503_v57  ;;  %v1182_v55 = vadd.f32 %v1181_v48, %v1180_v35  ;;  %v1803_v35 = vmov 1966171168  }
 0x1e6   : > { %v1157_v43 = vpop.f32.mrf.mxu1  ;;  %v1175_v56 = vadd.f32 %v1174_v50, %v1173_v36  ;;  %v1334_v36 = vunpack.c.l.s4 %v1803_v35 }
 0x1e7   : > { %v2138_v46 = vadd.f32 %v1701_v37, %v1101_v41  ;;  %v2140_v47 = vadd.f32 %v1157_v43, %v1093_v42  ;;  %v1199_v4 = vmul.f32 0.0625, %v1182_v55  ;;  %v1336_v37 = vlaneseq }
 0x1e8   : > { %v1198_v61 = vmul.f32 0.0625, %v1175_v56  ;;  %v1335_v40 = vunpack.c.0.s8 %v1334_v36 }
 0x1e9   : > { %v1190_v51 = vadd.f32 %v2138_v46, %v2134_v44  ;;  %v1183_v52 = vadd.f32 %v2140_v47, %v2136_v45  ;;  %v1203_v2 = vpack.c.bf16 %v1199_v4, %v1199_v4  ;;  %v1337_v41 = vshrl.u32 %v1336_v37, 7 }
 0x1ea   : > { %v1202_v6 = vpack.c.bf16 %v1198_v61, %v1198_v61 }
 0x1eb   : > { %v1191_v53 = vrot.slane %v1190_v51, 4  ;;  %v1184_v54 = vrot.slane %v1183_v52, 4  ;;  %v1227_v14 = vunpack.c.l.b16 %v1203_v2  ;;  %v1338_v42 = vsub.s32 %v1335_v40, %v1337_v41 }
 0x1ec   : > { %v1226_v15 = vunpack.c.l.b16 %v1202_v6  ;;  %v1359_v50 = vsub.s32 0, %v1337_v41 }
 0x1ed   : > { %v1192_v57 = vadd.f32 %v1191_v53, %v1190_v51  ;;  %v1185_v58 = vadd.f32 %v1184_v54, %v1183_v52 }
 0x1ee   : > { %v1231_v19 = vsel %vm1230_vm3, %v1227_v14, %v1226_v15 }
 0x1ef   : > { %v1193_v59 = vrot.slane %v1192_v57, 2  ;;  %v1186_v60 = vrot.slane %v1185_v58, 2 }
 0x1f1   : > { %v1194_v62 = vadd.f32 %v1193_v59, %v1192_v57  ;;  %v1187_v63 = vadd.f32 %v1186_v60, %v1185_v58 }
 0x1f3   : > { %v1195_v0 = vrot.slane %v1194_v62, 1  ;;  %v1188_v1 = vrot.slane %v1187_v63, 1 }
 0x1f5   : > { %v1196_v10 = vadd.f32 %v1195_v0, %v1194_v62  ;;  %v1189_v11 = vadd.f32 %v1188_v1, %v1187_v63 }
 0x1f7   : > { %v1201_v12 = vmul.f32 0.0625, %v1196_v10  ;;  %v1200_v13 = vmul.f32 0.0625, %v1189_v11 }
 0x1f9   : > { %v1205_v16 = vpack.c.bf16 %v1201_v12, %v1201_v12  ;;  %v1204_v8 = vpack.c.bf16 %v1200_v13, %v1200_v13 }
 0x1fb   : > { %v1229_v17 = vunpack.c.l.b16 %v1205_v16  ;;  %v1228_v18 = vunpack.c.l.b16 %v1204_v8 }
 0x1fd   : > { %v1233_v20 = vsel %vm1232_vm4, %v1228_v18, %v1231_v19 }
 0x1fe   : > { %v1235_v21 = vsel %vm1234_vm5, %v1229_v17, %v1233_v20 }
 0x1ff   : > { %v1236_v22 = vpack.c.b16 %v1235_v21, %v1235_v21 }
 0x201   : > { %1719 = vmatmul.mubr.bf16.vlgmr.msra.gmra.mxu0 %v1236_v22 }
 0x2c1   : > { %v1320_v23 = vpop.f32.mrf.mxu0 }
 0x2c2   : > { %v1536_v27 = vmul.f32 -1.442695, %v1320_v23 }
 0x2c3   : > { %v1720_v49 = vpop.f32.mrf.mxu0 }
 0x2c4   : > { %1789 = vpow2.f32 %v1536_v27 }
 0x2c5   : > { %v1323_v28 = vpop.f32.mrf.mxu0 }
 0x2c7   : > { %v1721_v29 = vpop.f32.mrf.mxu0 }
 0x2d1   : > { %v1790_v30 = vpop.eup %1789 }
 0x2d2   : > { %v1329_v34 = vadd.f32 1.0, %v1790_v30 }
 0x2d4   : > { %1791 = vrcp.f32 %v1329_v34 }
 0x2e1   : > { %v1792_v43 = vpop.eup %1791 }
 0x2e2   : > { %v1339_v48 = vrot.slane %v1792_v43, %v1338_v42 }
 0x2e4   : > { %v1340_v51 = vcombine.high %v1339_v48, %v1339_v48  ;;  %v1347_v52 = vrot.slane %v1339_v48, %v1338_v42 }
 0x2e6   : > { %v1354_v53 = vrot.slane %v1340_v51, %v1338_v42  ;;  %v1355_v54 = vcombine.high %v1347_v52, %v1347_v52  ;;  %v1360_v55 = vrot.slane %v1347_v52, %v1359_v50 }
 0x2e8   : > { %v1356_v56 = vcombine.high %v1354_v53, %v1354_v53  ;;  %v1364_v57 = vrot.slane %v1354_v53, %v1359_v50  ;;  %v1368_v58 = vrot.slane %v1355_v54, %v1359_v50  ;;  %v1377_v59 = vmul.f32 %v1360_v55, %v2126_v7 }
 0x2e9   : > { %v1378_v60 = vmul.f32 %v1360_v55, %v2128_v9 }
 0x2ea   : > { %v1372_v4 = vrot.slane %v1356_v56, %v1359_v50  ;;  %v1379_v61 = vmul.f32 %v1364_v57, %v2122_v3  ;;  %v1380_v62 = vmul.f32 %v1364_v57, %v2124_v5  ;;  %v1381_v63 = vmul.f32 %v1368_v58, %v2136_v45 }
 0x2eb   : > { %v1382_v0 = vmul.f32 %v1368_v58, %v2140_v47  ;;  %v1385_v1 = vadd.f32 %v1377_v59, %v1942_v24  ;;  %v1386_v2 = vadd.f32 %v1378_v60, %v1944_v25 }
 0x2ec   : > { %v1383_v7 = vmul.f32 %v1372_v4, %v2134_v44  ;;  %v1384_v9 = vmul.f32 %v1372_v4, %v2138_v46  ;;  %v1387_v3 = vadd.f32 %v1379_v61, %v1946_v26  ;;  %v1388_v5 = vadd.f32 %v1380_v62, %v1953_v31 }
 0x2ed   : > { %v1389_v45 = vadd.f32 %v1381_v63, %v1955_v32  ;;  %v1390_v47 = vadd.f32 %v1382_v0, %v1957_v33  ;;  %v1393_v24 = vmax.f32 %v1385_v1, 0.0  ;;  %v1394_v6 = vmax.f32 %v1386_v2, 0.0 }
 0x2ee   : > { %v1391_v25 = vadd.f32 %v1383_v7, %v1965_v38  ;;  %v1392_v10 = vadd.f32 %v1384_v9, %v1967_v39  ;;  %v1395_v11 = vmax.f32 %v1387_v3, 0.0  ;;  %v1396_v12 = vmax.f32 %v1388_v5, 0.0 }
 0x2ef   : > { %v1397_v13 = vmax.f32 %v1389_v45, 0.0  ;;  %v1398_v44 = vmax.f32 %v1390_v47, 0.0  ;;  %1401 = vst [vmem:[%s258_s16] sm:$0xff] %v1393_v24  ;;  %1402 = vst [vmem:[%s258_s16 + $0x8] sm:$0xff] %v1394_v6 }
 0x2f0   : > { %v1399_v46 = vmax.f32 %v1391_v25, 0.0  ;;  %v1400_v26 = vmax.f32 %v1392_v10, 0.0  ;;  %1403 = vst [vmem:[%s258_s16 + $0x10] sm:$0xff] %v1395_v11  ;;  %1404 = vst [vmem:[%s258_s16 + $0x18] sm:$0xff] %v1396_v12 }
 0x2f1   : > { %1405 = vst [vmem:[%s258_s16 + $0x20] sm:$0xff] %v1397_v13  ;;  %1406 = vst [vmem:[%s258_s16 + $0x28] sm:$0xff] %v1398_v44 }
 0x2f2   : > { %1407 = vst [vmem:[%s258_s16 + $0x30] sm:$0xff] %v1399_v46  ;;  %1408 = vst [vmem:[%s258_s16 + $0x38] sm:$0xff] %v1400_v26 }
 0x2f3 PF: > { %s16_s21 = sadd.s32 1, %s1799_s21  }
 0x2f4   : > { %p13_p4 = scmp.ge.s32.totalorder %s16_s21, 4  }
 0x2f6   :  { %15 = sbr.rel (!%p13_p4) target bundleno = 1 (0x1), region = 74 }

</bundles_post_ra>
